<compile_context>
chip_gen: v7x
topology: tpu7x:2x2x1
jax: 0.10.0
libtpu: 0.0.40
codegen_flags: <defaults>
</compile_context>

<pallas_src>
import jax
import jax.numpy as jnp
from jax.experimental import pallas as pl
from jax.experimental.pallas import tpu as pltpu


def _round_up(x, m):
    return ((x + m - 1) // m) * m


def policy_kernel(s_ref, w1_ref, b1_ref, w2_ref, b2_ref, out_ref):
    # Layer 1: cast streamed states to bf16 only as the MXU operand; f32 accumulate.
    s_bf = s_ref[...].astype(jnp.bfloat16)
    h = jnp.dot(s_bf, w1_ref[...], preferred_element_type=jnp.float32)
    h = jnp.maximum(h + b1_ref[...], 0.0)
    # Layer 2: bf16 MXU operand, f32 accumulate, f32 bias add.
    logits = jnp.dot(h.astype(jnp.bfloat16), w2_ref[...],
                     preferred_element_type=jnp.float32)
    logits = logits + b2_ref[...]
    # Numerically stable softmax over the action axis (per-row, no cross-batch reduce,
    # so stale rows in a partial final tile cannot contaminate valid rows).
    m = jnp.max(logits, axis=1, keepdims=True)
    e = jnp.exp(logits - m)
    denom = jnp.sum(e, axis=1, keepdims=True)
    out_ref[...] = (e * pl.reciprocal(denom, approx=True)).astype(out_ref.dtype)


def prepare_policy_params(w1, b1, w2, b2):
    """One-time weight prep (hoisted out of the hot path).

    w1: (state_dim, hidden), w2: (hidden, action_dim)  -- PyTorch (out,in) weights
    already transposed to (in,out).  Returns VMEM-ready device arrays:
    bf16 weights and (1, n) f32 biases."""
    return (
        jnp.asarray(w1, jnp.bfloat16),
        jnp.asarray(b1, jnp.float32).reshape(1, -1),
        jnp.asarray(w2, jnp.bfloat16),
        jnp.asarray(b2, jnp.float32).reshape(1, -1),
    )


def policy_forward(s, params, *, block_b=1024):
    """s: (B, state_dim) f32.  params: output of prepare_policy_params.
    Returns (B, action_dim) f32 action probabilities (softmax over dim=1)."""
    w1_bf, b1_r, w2_bf, b2_r = params
    B, state_dim = s.shape
    hidden = w1_bf.shape[1]
    action_dim = w2_bf.shape[1]

    # --- batch tiling: weights VMEM-resident, states/probs stream ------------------
    if B <= 8:
        tb = B  # single tile; block second-last dim == full array dim -> (8,128)-rule OK
    else:
        # Aim for >= 2 grid steps (megacore on v7x), keep tb a sublane multiple of 8.
        tb = min(block_b, _round_up(pl.cdiv(B, 2), 8))
        tb = max(8, (tb // 8) * 8)
    grid = (pl.cdiv(B, tb),)  # partial final tile handled by Pallas; no jnp.pad copy

    flops = 2 * B * (state_dim * hidden + hidden * action_dim)
    bytes_accessed = (B * state_dim * 4            # states read (f32)
                      + w1_bf.size * 2 + w2_bf.size * 2
                      + b1_r.size * 4 + b2_r.size * 4
                      + B * action_dim * 4)        # probs written (f32)

    return pl.pallas_call(
        policy_kernel,
        out_shape=jax.ShapeDtypeStruct((B, action_dim), jnp.float32),
        grid=grid,
        in_specs=[
            pl.BlockSpec((tb, state_dim), lambda i: (i, 0)),      # streamed states (f32)
            pl.BlockSpec((state_dim, hidden), lambda i: (0, 0)),  # resident w1 (bf16)
            pl.BlockSpec((1, hidden), lambda i: (0, 0)),          # resident b1 (f32)
            pl.BlockSpec((hidden, action_dim), lambda i: (0, 0)),  # resident w2 (bf16)
            pl.BlockSpec((1, action_dim), lambda i: (0, 0)),       # resident b2 (f32)
        ],
        out_specs=pl.BlockSpec((tb, action_dim), lambda i: (i, 0)),  # narrow output
        compiler_params=pltpu.CompilerParams(
            dimension_semantics=("parallel",),
        ),
        cost_estimate=pl.CostEstimate(
            flops=flops,
            transcendentals=B * action_dim,
            bytes_accessed=bytes_accessed,
        ),
    )(s, w1_bf, b1_r, w2_bf, b2_r)


def init_linear_params(key, in_features, out_features):
    """Mimics PyTorch nn.Linear default init: U(-1/sqrt(in), 1/sqrt(in))."""
    kw, kb = jax.random.split(key)
    bound = 1.0 / jnp.sqrt(jnp.float32(in_features))
    # PyTorch stores weight as (out, in); transpose to (in, out) for x @ W.
    w_pt = jax.random.uniform(kw, (out_features, in_features), jnp.float32,
                              minval=-bound, maxval=bound)
    b = jax.random.uniform(kb, (out_features,), jnp.float32,
                           minval=-bound, maxval=bound)
    return w_pt.T, b


def reference(s, w1, b1, w2, b2, *, match_bf16=True):
    """Plain-JAX reference of the PyTorch forward. If match_bf16, uses the same
    bf16-operand / f32-accumulate matmuls as the kernel for tight comparison."""
    if match_bf16:
        h = jnp.dot(s.astype(jnp.bfloat16), w1.astype(jnp.bfloat16),
                    preferred_element_type=jnp.float32)
        h = jnp.maximum(h + b1, 0.0)
        logits = jnp.dot(h.astype(jnp.bfloat16), w2.astype(jnp.bfloat16),
                         preferred_element_type=jnp.float32) + b2
    else:
        h = jnp.maximum(s @ w1 + b1, 0.0)
        logits = h @ w2 + b2
    return jax.nn.softmax(logits, axis=1)


if __name__ == "__main__":
    # Small shapes consistent with the module.
    batch, state_dim, hidden_width, action_dim = 8, 16, 32, 8

    key = jax.random.PRNGKey(0)
    k_s, k_l1, k_l2, k_big = jax.random.split(key, 4)

    s = jax.random.normal(k_s, (batch, state_dim), jnp.float32)
    w1, b1 = init_linear_params(k_l1, state_dim, hidden_width)
    w2, b2 = init_linear_params(k_l2, hidden_width, action_dim)

    params = prepare_policy_params(w1, b1, w2, b2)   # one-time weight prep

    # --- small-batch run (single grid step, tb == B) ---------------------------------
    a_prob = jax.block_until_ready(policy_forward(s, params))
    assert a_prob.shape == (batch, action_dim)

    ref_match = reference(s, w1, b1, w2, b2, match_bf16=True)
    ref_f32 = reference(s, w1, b1, w2, b2, match_bf16=False)
    assert jnp.allclose(a_prob, ref_match, atol=5e-3, rtol=5e-3), "bf16-matched ref mismatch"
    assert jnp.allclose(a_prob, ref_f32, atol=2e-2, rtol=2e-2), "f32 ref mismatch"
    assert jnp.allclose(jnp.sum(a_prob, axis=1), 1.0, atol=5e-3), "probs do not sum to 1"

    # --- larger batch exercising the multi-step grid + partial final tile ------------
    big_b = 200  # not a multiple of the tile -> exercises Pallas partial-block handling
    s_big = jax.random.normal(k_big, (big_b, state_dim), jnp.float32)
    a_big = jax.block_until_ready(policy_forward(s_big, params, block_b=64))
    assert a_big.shape == (big_b, action_dim)
    ref_big = reference(s_big, w1, b1, w2, b2, match_bf16=True)
    assert jnp.allclose(a_big, ref_big, atol=5e-3, rtol=5e-3), "batched ref mismatch"
    assert jnp.allclose(jnp.sum(a_big, axis=1), 1.0, atol=5e-3)

    # --- default tile path (tb derived from cdiv(B,2), >= 2 grid steps on v7x) -------
    a_big2 = jax.block_until_ready(policy_forward(s_big, params))
    assert jnp.allclose(a_big2, ref_big, atol=5e-3, rtol=5e-3), "default-tile mismatch"

    print("KERNEL_OK")
</pallas_src>

<mosaic_0001>
module attributes {stable_mosaic.version = 11 : i64} {
  func.func @policy_kernel(%arg0: i32, %arg1: memref<8x16xf32, #tpu.memory_space<vmem>>, %arg2: memref<16x32xbf16, #tpu.memory_space<vmem>>, %arg3: memref<1x32xf32, #tpu.memory_space<vmem>>, %arg4: memref<32x8xbf16, #tpu.memory_space<vmem>>, %arg5: memref<1x8xf32, #tpu.memory_space<vmem>>, %arg6: memref<8x8xf32, #tpu.memory_space<vmem>>) attributes {dimension_semantics = [#tpu.dimension_semantics<parallel>], iteration_bounds = array<i64: 1>, scalar_prefetch = 0 : i64, scratch_operands = 0 : i64, tpu.core_type = #tpu.core_type<tc>, window_params = [{transform_indices = @transform_0, window_bounds = array<i64: 8, 16>}, {pipeline_mode = #tpu.pipeline_mode<synchronous>, transform_indices = @transform_1, window_bounds = array<i64: 16, 32>}, {pipeline_mode = #tpu.pipeline_mode<synchronous>, transform_indices = @transform_2, window_bounds = array<i64: 1, 32>}, {pipeline_mode = #tpu.pipeline_mode<synchronous>, transform_indices = @transform_3, window_bounds = array<i64: 32, 8>}, {pipeline_mode = #tpu.pipeline_mode<synchronous>, transform_indices = @transform_4, window_bounds = array<i64: 1, 8>}, {transform_indices = @transform_5, window_bounds = array<i64: 8, 8>}]} {
    %c0 = arith.constant 0 : index
    %c0_0 = arith.constant 0 : index
    %0 = vector.load %arg1[%c0, %c0_0] : memref<8x16xf32, #tpu.memory_space<vmem>>, vector<8x16xf32>
    %1 = arith.truncf %0 : vector<8x16xf32> to vector<8x16xbf16>
    %c0_1 = arith.constant 0 : index
    %c0_2 = arith.constant 0 : index
    %2 = vector.load %arg2[%c0_1, %c0_2] : memref<16x32xbf16, #tpu.memory_space<vmem>>, vector<16x32xbf16>
    %cst = arith.constant dense<0.000000e+00> : vector<8x32xf32>
    %3 = tpu.matmul %1, %2, %cst {dimension_numbers = #tpu.dot_dimension_numbers<[1], [0], [0], [1], [0, 0, 1, 1], [], []>} : vector<8x16xbf16>, vector<16x32xbf16>, vector<8x32xf32> -> vector<8x32xf32>
    %c0_3 = arith.constant 0 : index
    %c0_4 = arith.constant 0 : index
    %4 = vector.load %arg3[%c0_3, %c0_4] : memref<1x32xf32, #tpu.memory_space<vmem>>, vector<1x32xf32>
    %5 = vector.broadcast %4 : vector<1x32xf32> to vector<8x32xf32>
    %6 = arith.addf %3, %5 : vector<8x32xf32>
    %cst_5 = arith.constant 0.000000e+00 : f32
    %7 = vector.broadcast %cst_5 : f32 to vector<8x32xf32>
    %8 = arith.maximumf %6, %7 : vector<8x32xf32>
    %9 = arith.truncf %8 : vector<8x32xf32> to vector<8x32xbf16>
    %c0_6 = arith.constant 0 : index
    %c0_7 = arith.constant 0 : index
    %10 = vector.load %arg4[%c0_6, %c0_7] : memref<32x8xbf16, #tpu.memory_space<vmem>>, vector<32x8xbf16>
    %cst_8 = arith.constant dense<0.000000e+00> : vector<8x8xf32>
    %11 = tpu.matmul %9, %10, %cst_8 {dimension_numbers = #tpu.dot_dimension_numbers<[1], [0], [0], [1], [0, 0, 1, 1], [], []>} : vector<8x32xbf16>, vector<32x8xbf16>, vector<8x8xf32> -> vector<8x8xf32>
    %c0_9 = arith.constant 0 : index
    %c0_10 = arith.constant 0 : index
    %12 = vector.load %arg5[%c0_9, %c0_10] : memref<1x8xf32, #tpu.memory_space<vmem>>, vector<1x8xf32>
    %13 = vector.broadcast %12 : vector<1x8xf32> to vector<8x8xf32>
    %14 = arith.addf %11, %13 : vector<8x8xf32>
    %cst_11 = arith.constant dense<0xFF800000> : vector<8xf32>
    %15 = vector.multi_reduction <maximumf>, %14, %cst_11 [1] : vector<8x8xf32> to vector<8xf32>
    %16 = vector.shape_cast %15 : vector<8xf32> to vector<8x1xf32>
    %17 = vector.broadcast %16 : vector<8x1xf32> to vector<8x8xf32>
    %18 = arith.subf %14, %17 : vector<8x8xf32>
    %19 = math.exp %18 : vector<8x8xf32>
    %cst_12 = arith.constant dense<0.000000e+00> : vector<8xf32>
    %20 = vector.multi_reduction <add>, %19, %cst_12 [1] : vector<8x8xf32> to vector<8xf32>
    %21 = vector.shape_cast %20 : vector<8xf32> to vector<8x1xf32>
    %22 = tpu.reciprocal %21 {approx = true} : vector<8x1xf32> -> vector<8x1xf32>
    %23 = vector.broadcast %22 : vector<8x1xf32> to vector<8x8xf32>
    %24 = arith.mulf %19, %23 : vector<8x8xf32>
    %c0_13 = arith.constant 0 : index
    %c0_14 = arith.constant 0 : index
    %25 = vector.load %arg6[%c0_13, %c0_14] : memref<8x8xf32, #tpu.memory_space<vmem>>, vector<8x8xf32>
    tpu.vector_store %arg6[%c0_13, %c0_14], %24 {strides = array<i32>} : memref<8x8xf32, #tpu.memory_space<vmem>>, vector<8x8xf32>,
    return
  }
  func.func @transform_0(%arg0: i32) -> (i32, i32) {
    %c0_i32 = arith.constant 0 : i32
    %c0_i32_0 = arith.constant 0 : i32
    return %arg0, %c0_i32 : i32, i32
  }
  func.func @transform_1(%arg0: i32) -> (i32, i32) {
    %c0_i32 = arith.constant 0 : i32
    %c0_i32_0 = arith.constant 0 : i32
    %c0_i32_1 = arith.constant 0 : i32
    return %c0_i32, %c0_i32_0 : i32, i32
  }
  func.func @transform_2(%arg0: i32) -> (i32, i32) {
    %c0_i32 = arith.constant 0 : i32
    %c0_i32_0 = arith.constant 0 : i32
    %c0_i32_1 = arith.constant 0 : i32
    return %c0_i32, %c0_i32_0 : i32, i32
  }
  func.func @transform_3(%arg0: i32) -> (i32, i32) {
    %c0_i32 = arith.constant 0 : i32
    %c0_i32_0 = arith.constant 0 : i32
    %c0_i32_1 = arith.constant 0 : i32
    return %c0_i32, %c0_i32_0 : i32, i32
  }
  func.func @transform_4(%arg0: i32) -> (i32, i32) {
    %c0_i32 = arith.constant 0 : i32
    %c0_i32_0 = arith.constant 0 : i32
    %c0_i32_1 = arith.constant 0 : i32
    return %c0_i32, %c0_i32_0 : i32, i32
  }
  func.func @transform_5(%arg0: i32) -> (i32, i32) {
    %c0_i32 = arith.constant 0 : i32
    %c0_i32_0 = arith.constant 0 : i32
    return %arg0, %c0_i32 : i32, i32
  }
}

</mosaic_0001>

<bundles_post_ra>
// kernel: tpu_custom_call.1
= control target key start
LH: loop header
LB: loop body
LE: loop exit
PB: predicated region body
PF: predicated region fallthrough
CT: control target
= control target key end

     0   :  { %v239_v1 = vmov 0.0   ;;  %vm39_vm0 = vcmask 130048   ;;  %vm240_vm1 = vmmov 0   ;;  %s305_s0 = inlined_call_operand.vmem [shape: f32[8,16], index: 0, kind: input, shape index: {}]   ;;  %s306_s1 = inlined_call_operand.vmem [shape: bf16[16,32], index: 1, kind: input, shape index: {}]   ;;  %s307_s2 = inlined_call_operand.vmem [shape: f32[1,32], index: 2, kind: input, shape index: {}]   ;;  %s308_s3 = inlined_call_operand.vmem [shape: bf16[32,8], index: 3, kind: input, shape index: {}]   ;;  %s309_s4 = inlined_call_operand.vmem [shape: f32[1,8], index: 4, kind: input, shape index: {}]   ;;  %s310_s5 = inlined_call_operand.hbm [shape: f32[8,8], index: 5, kind: output, shape index: {}]  }
   0x1   :  { %v208_v0 = vld [vmem:[%s306_s1] sm:$0xff]   ;;  %191 = vmatprep.subr.bf16.mxu0 %v239_v1  ;;  %197 = vmatprep.subr.bf16.mxu1 %v239_v1 }
   0x2   :  { %v22_v2 = vld [vmem:[%s305_s0] sm:$0xff]  ;;  %192 = vmatpush3.bf16.msra.mxu0 %v208_v0  ;;  %193 = vmatprep.mubr.msk.bf16.mxu0 %vm240_vm1, %v239_v1 }
   0x3   :  { %v23_v3 = vpack.c.bf16 %v22_v2, %v22_v2  ;;  %201 = vmatprep.mubr.msk.bf16.mxu1 %vm240_vm1, %v239_v1 }
   0x4   :  { %10 = vsyncpa [#allocation3], 0  ;;  %v209_v4 = vld [vmem:[%s308_s3] sm:$0xff]   ;;  %v210_v5 = vld [vmem:[%s308_s3 + $0x8] sm:$0xff]   ;;  %vm108_vm2 = vcmask 261120   ;;  %vm152_vm3 = vcmask 64512  }
   0x5   :  { %194 = vmatmul.mubr.msk.bf16.vlgmr.msra.gmra.mrb[0].mxu0 %vm39_vm0, %v23_v3  ;;  %198 = vmatpush3.bf16.msra.mxu1 %v209_v4  ;;  %v179_v6 = vld [vmem:[%s307_s2] ss:$0 sm:$0xff]  ;;  %s241_s2 = smov [#allocation2]  }
   0x6   :  { %199 = vmatprep.subr.bf16.mxu1 %v239_v1  ;;  %v182_v14 = vld [vmem:[%s309_s4] ss:$0 sm:$0xff]  ;;  %s171_s3 = sshll.u32 %s241_s2, 4  ;;  %s172_s3 = int_to_ptr.vmem [resolvable:$true] %s171_s3 }
   0x7   :  { %s215_s4 = scalar_lea.vmem %s172_s3, 128  ;;  %p220_p1 = scmp.lt.s32.totalorder %s172_s3, %s172_s3 }
   0x8   :  { %p216_p0 = scmp.ne.s32.totalorder %s172_s3, %s215_s4  ;;  %p221_p2 = scmp.lt.s32.totalorder %s215_s4, %s215_s4 }
   0x9   :  { %200 = vmatpush3.bf16.msra.mxu1 %v210_v5 }
   0xa   :  { %p222_p3 = por %p221_p2, %p220_p1 }
   0xc   :  { %p223_p4 = pnand %p222_p3, %p216_p0 }
  0xd8   :  { %v77_v7 = vpop.f32.mrb[0].mxu0 }
  0xd9   :  { %v78_v8 = vadd.f32 %v179_v6, %v77_v7  ;;  %v195_v9 = vpop.f32.mrb[1].mxu0 }
  0xda   :  { %v80_v10 = vpop.f32.mrb[2].mxu0 }
  0xdb   :  { %v83_v11 = vmax.f32 %v78_v8, 0.0  ;;  %v196_v12 = vpop.f32.mrb[3].mxu0 }
  0xdd   :  { %v84_v13 = vpack.c.bf16 %v83_v11, %v83_v11 }
  0xdf   :  { %202 = vmatmul.mubr.msk.bf16.vlgmr.msra.gmra.mrb[0].mxu1 %vm108_vm2, %v84_v13 }
 0x1b2   :  { %v146_v15 = vpop.f32.mrb[0].mxu1 }
 0x1b3   :  { %v147_v16 = vadd.f32 %v182_v14, %v146_v15  ;;  %v203_v17 = vpop.f32.mrb[1].mxu1 }
 0x1b4   :  { %v149_v18 = vpop.f32.mrb[2].mxu1 }
 0x1b5   :  { %v204_v19 = vpop.f32.mrb[3].mxu1  ;;  %v153_v20 = vsel %vm152_vm3, %v147_v16, -inf }
 0x1b6   :  { %154 = vmax.xlane.f32.xlu0 %v153_v20 }
 0x243   :  { %v155_v21 = vpop.xlane.xlu0 %154 }
 0x244   :  { %v156_v22 = vsub.f32 %v147_v16, %v155_v21 }
 0x246   :  { %v157_v23 = vmul.f32 1.442695, %v156_v22 }
 0x248   :  { %211 = vpow2.f32 %v157_v23 }
 0x252   :  { %v212_v24 = vpop.eup %211 }
 0x253   :  { %v159_v25 = vsel %vm152_vm3, %v212_v24, 0.0 }
 0x254   :  { %160 = vadd.xlane.f32.xlu0 %v159_v25 }
 0x2e1   :  { %v161_v26 = vpop.xlane.xlu0 %160 }
 0x2e2   :  { %213 = vrcp.f32 %v161_v26 }
 0x2ec   :  { %v214_v27 = vpop.eup %213 }
 0x2ed   :  { %v163_v28 = vmul.f32 %v214_v27, %v212_v24 }
 0x2ef   :  { %164 = vst.msk [vmem:[#allocation2] sm:$0xff] %vm152_vm3, %v163_v28 }
 0x2f0   :  { %226 = shalt.err (!%p223_p4)
}
 0x2f1   :  { %s227_s30 = scalar_lea.hbm %s310_s5, 128 }
 0x2f2   :  { %p228_p5 = scmp.ne.s32.totalorder %s310_s5, %s227_s30  ;;  %p231_p6 = scmp.lt.u32.totalorder %s227_s30, %s310_s5 }
 0x2f4   :  { %p233_p7 = pnand %p231_p6, %p228_p5 }
 0x2f6   :  { %236 = shalt.err (!%p233_p7)
}
 0x2f7   :  { %174 = dma.vmem_to_hbm [thread:$0]  %s172_s3, 128, %s310_s5, [#allocation3]  }
 0x2f8   :  { %237 = dma.done.wait [#allocation3], 128  }
 0x2f9   :  { %238 = vsyncadd [#allocation3], 4294967168 }
 0x2fa   :  { %178 = vsyncpa [#allocation3], 1 }

</bundles_post_ra>
